<compile_context>
chip_gen: v7x
topology: tpu7x:2x2x1
jax: 0.10.0
libtpu: 0.0.40
codegen_flags: <defaults>
</compile_context>

<pallas_src>
import functools

import jax
import jax.numpy as jnp
from jax.experimental import pallas as pl
from jax.experimental.pallas import tpu as pltpu


def _round_up(x: int, m: int) -> int:
    return ((x + m - 1) // m) * m


def mean_pool_kernel(x_ref, m_ref, o_ref, acc_ref, msum_ref):
    # x_ref:    (Bt, TILE_S, TILE_H)  activations tile (native dtype)
    # m_ref:    (Bt, TILE_S, 1)       mask tile
    # o_ref:    (Bt, TILE_H)          output tile (f32)
    # acc_ref:  (Bt, TILE_H) f32      running masked sum over S
    # msum_ref: (Bt, 1)      f32      running mask sum over S
    s_idx = pl.program_id(2)

    @pl.when(s_idx == 0)
    def _():
        acc_ref[...] = jnp.zeros_like(acc_ref)
        msum_ref[...] = jnp.zeros_like(msum_ref)

    x = x_ref[...].astype(jnp.float32)          # (Bt, TS, TH)
    m = m_ref[...].astype(jnp.float32)          # (Bt, TS, 1) -> lane broadcast
    acc_ref[...] += jnp.sum(x * m, axis=1)      # (Bt, TH)
    msum_ref[...] += jnp.sum(m, axis=1)         # (Bt, 1)

    @pl.when(s_idx == pl.num_programs(2) - 1)
    def _():
        denom = jnp.maximum(msum_ref[...], 1e-9)   # torch.clamp(min=1e-9)
        o_ref[...] = (acc_ref[...] / denom).astype(o_ref.dtype)


@functools.partial(jax.jit, static_argnames=("bt", "tile_s", "tile_h"))
def mean_pooling(last_hidden_state, attention_mask, *, bt=8, tile_s=512, tile_h=512):
    B, S, H = last_hidden_state.shape
    assert attention_mask.shape == (B, S)

    # ---- choose tiles (sublane multiple of 8, lane multiple of 128) ----
    Bt = bt
    Bp = _round_up(B, Bt)

    Sp = _round_up(S, 8)
    if Sp <= tile_s:
        TILE_S = Sp
    else:
        TILE_S = tile_s
        Sp = _round_up(Sp, TILE_S)

    Hp = _round_up(H, 128)
    if Hp <= tile_h:
        TILE_H = Hp
    else:
        TILE_H = tile_h
        Hp = _round_up(Hp, TILE_H)

    # ---- pad to tile multiples (zeros: masked out / sliced off) ----
    x = last_hidden_state
    if (Bp, Sp, Hp) != (B, S, H):
        x = jnp.pad(x, ((0, Bp - B), (0, Sp - S), (0, Hp - H)))
    mask3 = attention_mask[:, :, None]  # (B, S, 1): per-sublane scalar
    if (Bp, Sp) != (B, S):
        mask3 = jnp.pad(mask3, ((0, Bp - B), (0, Sp - S), (0, 0)))

    grid = (Bp // Bt, Hp // TILE_H, Sp // TILE_S)

    out = pl.pallas_call(
        mean_pool_kernel,
        out_shape=jax.ShapeDtypeStruct((Bp, Hp), jnp.float32),
        grid_spec=pltpu.PrefetchScalarGridSpec(
            num_scalar_prefetch=0,
            grid=grid,
            in_specs=[
                pl.BlockSpec((Bt, TILE_S, TILE_H), lambda b, h, s: (b, s, h)),
                pl.BlockSpec((Bt, TILE_S, 1), lambda b, h, s: (b, s, 0)),
            ],
            out_specs=pl.BlockSpec((Bt, TILE_H), lambda b, h, s: (b, h)),
            scratch_shapes=[
                pltpu.VMEM((Bt, TILE_H), jnp.float32),
                pltpu.VMEM((Bt, 1), jnp.float32),
            ],
        ),
        compiler_params=pltpu.CompilerParams(
            dimension_semantics=("parallel", "parallel", "arbitrary"),
            vmem_limit_bytes=64 * 1024 * 1024,
        ),
    )(x, mask3)

    return out[:B, :H]


def mean_pooling_ref(last_hidden_state, attention_mask):
    m = attention_mask[..., None].astype(jnp.float32)
    s = jnp.sum(last_hidden_state.astype(jnp.float32) * m, axis=1)
    d = jnp.maximum(jnp.sum(m, axis=1), 1e-9)
    return s / d


if __name__ == "__main__":
    key = jax.random.PRNGKey(0)
    k1, k2 = jax.random.split(key)

    B, S, H = 2, 8, 32
    last_hidden_state = jax.random.normal(k1, (B, S, H), dtype=jnp.float32)
    # Binary attention mask (some padded positions), like a transformer mask.
    attention_mask = (jax.random.uniform(k2, (B, S)) > 0.3).astype(jnp.float32)

    out = mean_pooling(last_hidden_state, attention_mask)
    out = jax.block_until_ready(out)

    ref = mean_pooling_ref(last_hidden_state, attention_mask)
    assert out.shape == (B, H)
    assert jnp.allclose(out, ref, atol=1e-5, rtol=1e-5)

    # Quick second check with non-aligned, larger shapes and bf16 activations.
    B2, S2, H2 = 5, 70, 200
    k3, k4 = jax.random.split(k2)
    x2 = jax.random.normal(k3, (B2, S2, H2), dtype=jnp.bfloat16)
    m2 = (jax.random.uniform(k4, (B2, S2)) > 0.5).astype(jnp.float32)
    out2 = jax.block_until_ready(mean_pooling(x2, m2))
    ref2 = mean_pooling_ref(x2, m2)
    assert out2.shape == (B2, H2)
    assert jnp.allclose(out2, ref2, atol=2e-2, rtol=2e-2)

    print("KERNEL_OK")
</pallas_src>

<mosaic_0001>
module attributes {stable_mosaic.version = 11 : i64} {
  func.func @mean_pool_kernel(%arg0: i32, %arg1: i32, %arg2: i32, %arg3: memref<8x8x128xf32, #tpu.memory_space<vmem>>, %arg4: memref<8x8x1xf32, #tpu.memory_space<vmem>>, %arg5: memref<8x128xf32, #tpu.memory_space<vmem>>, %arg6: memref<8x128xf32, #tpu.memory_space<vmem>>, %arg7: memref<8x1xf32, #tpu.memory_space<vmem>>) attributes {dimension_semantics = [#tpu.dimension_semantics<parallel>, #tpu.dimension_semantics<parallel>, #tpu.dimension_semantics<arbitrary>], iteration_bounds = array<i64: 1, 1, 1>, scalar_prefetch = 0 : i64, scratch_operands = 2 : i64, tpu.core_type = #tpu.core_type<tc>, window_params = [{transform_indices = @transform_0, window_bounds = array<i64: 8, 8, 128>}, {transform_indices = @transform_1, window_bounds = array<i64: 8, 8, 1>}, {transform_indices = @transform_2, window_bounds = array<i64: 8, 128>}]} {
    %c0_i32 = arith.constant 0 : i32
    %0 = arith.cmpi eq, %arg2, %c0_i32 : i32
    %1 = arith.extui %0 : i1 to i32
    %c0_i32_0 = arith.constant 0 : i32
    %2 = arith.cmpi ne, %1, %c0_i32_0 : i32
    scf.if %2 {
      %cst_17 = arith.constant 0.000000e+00 : f32
      %18 = vector.broadcast %cst_17 : f32 to vector<8x128xf32>
      %c0_18 = arith.constant 0 : index
      %c0_19 = arith.constant 0 : index
      %19 = vector.load %arg6[%c0_18, %c0_19] : memref<8x128xf32, #tpu.memory_space<vmem>>, vector<8x128xf32>
      tpu.vector_store %arg6[%c0_18, %c0_19], %18 {strides = array<i32>} : memref<8x128xf32, #tpu.memory_space<vmem>>, vector<8x128xf32>,
      %cst_20 = arith.constant 0.000000e+00 : f32
      %20 = vector.broadcast %cst_20 : f32 to vector<8x1xf32>
      %c0_21 = arith.constant 0 : index
      %c0_22 = arith.constant 0 : index
      %21 = vector.load %arg7[%c0_21, %c0_22] : memref<8x1xf32, #tpu.memory_space<vmem>>, vector<8x1xf32>
      tpu.vector_store %arg7[%c0_21, %c0_22], %20 {strides = array<i32>} : memref<8x1xf32, #tpu.memory_space<vmem>>, vector<8x1xf32>,
    } else {
    }
    %c0 = arith.constant 0 : index
    %c0_1 = arith.constant 0 : index
    %c0_2 = arith.constant 0 : index
    %3 = vector.load %arg3[%c0, %c0_1, %c0_2] : memref<8x8x128xf32, #tpu.memory_space<vmem>>, vector<8x8x128xf32>
    %c0_3 = arith.constant 0 : index
    %c0_4 = arith.constant 0 : index
    %c0_5 = arith.constant 0 : index
    %4 = vector.load %arg4[%c0_3, %c0_4, %c0_5] : memref<8x8x1xf32, #tpu.memory_space<vmem>>, vector<8x8x1xf32>
    %c0_6 = arith.constant 0 : index
    %c0_7 = arith.constant 0 : index
    %5 = vector.load %arg6[%c0_6, %c0_7] : memref<8x128xf32, #tpu.memory_space<vmem>>, vector<8x128xf32>
    %6 = vector.broadcast %4 : vector<8x8x1xf32> to vector<8x8x128xf32>
    %7 = arith.mulf %3, %6 : vector<8x8x128xf32>
    %cst = arith.constant dense<0.000000e+00> : vector<8x128xf32>
    %8 = vector.multi_reduction <add>, %7, %cst [1] : vector<8x8x128xf32> to vector<8x128xf32>
    %9 = arith.addf %5, %8 : vector<8x128xf32>
    %c0_8 = arith.constant 0 : index
    %c0_9 = arith.constant 0 : index
    %10 = vector.load %arg6[%c0_8, %c0_9] : memref<8x128xf32, #tpu.memory_space<vmem>>, vector<8x128xf32>
    tpu.vector_store %arg6[%c0_8, %c0_9], %9 {strides = array<i32>} : memref<8x128xf32, #tpu.memory_space<vmem>>, vector<8x128xf32>,
    %c0_10 = arith.constant 0 : index
    %c0_11 = arith.constant 0 : index
    %11 = vector.load %arg7[%c0_10, %c0_11] : memref<8x1xf32, #tpu.memory_space<vmem>>, vector<8x1xf32>
    %cst_12 = arith.constant dense<0.000000e+00> : vector<8x1xf32>
    %12 = vector.multi_reduction <add>, %4, %cst_12 [1] : vector<8x8x1xf32> to vector<8x1xf32>
    %13 = arith.addf %11, %12 : vector<8x1xf32>
    %c0_13 = arith.constant 0 : index
    %c0_14 = arith.constant 0 : index
    %14 = vector.load %arg7[%c0_13, %c0_14] : memref<8x1xf32, #tpu.memory_space<vmem>>, vector<8x1xf32>
    tpu.vector_store %arg7[%c0_13, %c0_14], %13 {strides = array<i32>} : memref<8x1xf32, #tpu.memory_space<vmem>>, vector<8x1xf32>,
    %c0_i32_15 = arith.constant 0 : i32
    %15 = arith.cmpi eq, %arg2, %c0_i32_15 : i32
    %16 = arith.extui %15 : i1 to i32
    %c0_i32_16 = arith.constant 0 : i32
    %17 = arith.cmpi ne, %16, %c0_i32_16 : i32
    scf.if %17 {
      %c0_17 = arith.constant 0 : index
      %c0_18 = arith.constant 0 : index
      %18 = vector.load %arg7[%c0_17, %c0_18] : memref<8x1xf32, #tpu.memory_space<vmem>>, vector<8x1xf32>
      %cst_19 = arith.constant 9.99999971E-10 : f32
      %19 = vector.broadcast %cst_19 : f32 to vector<8x1xf32>
      %20 = arith.maximumf %18, %19 : vector<8x1xf32>
      %c0_20 = arith.constant 0 : index
      %c0_21 = arith.constant 0 : index
      %21 = vector.load %arg6[%c0_20, %c0_21] : memref<8x128xf32, #tpu.memory_space<vmem>>, vector<8x128xf32>
      %22 = vector.broadcast %20 : vector<8x1xf32> to vector<8x128xf32>
      %23 = arith.divf %21, %22 : vector<8x128xf32>
      %c0_22 = arith.constant 0 : index
      %c0_23 = arith.constant 0 : index
      %24 = vector.load %arg5[%c0_22, %c0_23] : memref<8x128xf32, #tpu.memory_space<vmem>>, vector<8x128xf32>
      tpu.vector_store %arg5[%c0_22, %c0_23], %23 {strides = array<i32>} : memref<8x128xf32, #tpu.memory_space<vmem>>, vector<8x128xf32>,
    } else {
    }
    return
  }
  func.func @transform_0(%arg0: i32, %arg1: i32, %arg2: i32) -> (i32, i32, i32) {
    %c0_i32 = arith.constant 0 : i32
    return %arg0, %arg2, %arg1 : i32, i32, i32
  }
  func.func @transform_1(%arg0: i32, %arg1: i32, %arg2: i32) -> (i32, i32, i32) {
    %c0_i32 = arith.constant 0 : i32
    %c0_i32_0 = arith.constant 0 : i32
    return %arg0, %arg2, %c0_i32 : i32, i32, i32
  }
  func.func @transform_2(%arg0: i32, %arg1: i32, %arg2: i32) -> (i32, i32) {
    %c0_i32 = arith.constant 0 : i32
    return %arg0, %arg1 : i32, i32
  }
}

</mosaic_0001>

<bundles_post_ra>
// kernel: mean_pooling.1
= control target key start
LH: loop header
LB: loop body
LE: loop exit
PB: predicated region body
PF: predicated region fallthrough
CT: control target
= control target key end

     0   :  { %7 = vsyncpa [#allocation5], 0  ;;  %s456_s0 = inlined_call_operand.hbm [shape: f32[8,8,128], index: 0, kind: input, shape index: {}]   ;;  %s457_s1 = inlined_call_operand.hbm [shape: f32[8,8,1], index: 1, kind: input, shape index: {}]   ;;  %s458_s2 = inlined_call_operand.hbm [shape: f32[8,128], index: 2, kind: output, shape index: {}]  }
   0x1   :  { %8 = vsyncpa [#allocation8], 0 }
   0x2   :  { %9 = vsyncpa [#allocation6], 0  ;;  %s374_s9 = smov [#allocation4]   ;;  %s302_s13 = scalar_lea.hbm %s456_s0, 1024 }
   0x3   :  { %s15_s10 = sshll.u32 %s374_s9, 4  ;;  %p303_p0 = scmp.ne.s32.totalorder %s456_s0, %s302_s13  ;;  %s16_s10 = int_to_ptr.vmem [resolvable:$true] %s15_s10 }
   0x4   :  { %p306_p1 = scmp.lt.u32.totalorder %s302_s13, %s456_s0 }
   0x6   :  { %p308_p2 = pnand %p306_p1, %p303_p0 }
   0x8   :  { %311 = shalt.err (!%p308_p2)
}
   0x9   :  { %s312_s18 = scalar_lea.vmem %s16_s10, 1024  ;;  %p317_p4 = scmp.lt.s32.totalorder %s16_s10, %s16_s10 }
   0xa   :  { %p313_p3 = scmp.ne.s32.totalorder %s16_s10, %s312_s18  ;;  %p318_p5 = scmp.lt.s32.totalorder %s312_s18, %s312_s18 }
   0xc   :  { %p319_p6 = por %p318_p5, %p317_p4 }
   0xe   :  { %p320_p7 = pnand %p319_p6, %p313_p3 }
  0x10   :  { %323 = shalt.err (!%p320_p7)
}
  0x11   :  { %s375_s19 = smov 128   ;;  %s376_s20 = smov 8  }
  0x12   :  { %21 = dma.hbm_to_vmem [thread:$0]  %s456_s0, 1024, %s16_s10, [#allocation5], %s375_s19, %s375_s19, %s376_s20  }
  0x13   :  { %s377_s23 = smov [#allocation7]   ;;  %s324_s27 = scalar_lea.hbm %s457_s1, 1024 }
  0x14   :  { %s27_s24 = sshll.u32 %s377_s23, 4  ;;  %p325_p8 = scmp.ne.s32.totalorder %s457_s1, %s324_s27  ;;  %s28_s24 = int_to_ptr.vmem [resolvable:$true] %s27_s24 }
  0x15   :  { %p328_p9 = scmp.lt.u32.totalorder %s324_s27, %s457_s1 }
  0x17   :  { %p330_p10 = pnand %p328_p9, %p325_p8 }
  0x19   :  { %333 = shalt.err (!%p330_p10)
}
  0x1a   :  { %s334_s4 = scalar_lea.vmem %s28_s24, 1024  ;;  %p339_p12 = scmp.lt.s32.totalorder %s28_s24, %s28_s24 }
  0x1b   :  { %p335_p11 = scmp.ne.s32.totalorder %s28_s24, %s334_s4  ;;  %p340_p13 = scmp.lt.s32.totalorder %s334_s4, %s334_s4 }
  0x1d   :  { %p341_p0 = por %p340_p13, %p339_p12 }
  0x1f   :  { %p342_p1 = pnand %p341_p0, %p335_p11 }
  0x21   :  { %345 = shalt.err (!%p342_p1)
}
  0x22   :  { %33 = dma.hbm_to_vmem [thread:$0]  %s457_s1, 1024, %s28_s24, [#allocation8], %s375_s19, %s375_s19, %s376_s20  }
  0x23   :  { %368 = dma.done.wait [#allocation5], 1024  }
  0x24   :  { %369 = vsyncadd [#allocation5], 4294966272 }
  0x25   :  { %370 = dma.done.wait [#allocation8], 1024  }
  0x26   :  { %371 = vsyncadd [#allocation8], 4294966272  ;;  %v378_v0 = vmov 0   ;;  %vm45_vm0 = vcmask 7168   ;;  %v379_v1 = vmov 0.0   ;;  %v57_v2 = vld [vmem:[#allocation7 + $0x10] sm:$0xff] }
  0x27   :  { %299 = vset.pattern.permute.xlu1 %v378_v0  ;;  %298 = vset.pattern.permute.xlu0 %v378_v0  ;;  %46 = vst.msk [vmem:[#allocation3] sm:$0xff] %vm45_vm0, %v379_v1  ;;  %v55_v3 = vld [vmem:[#allocation7] sm:$0xff]  ;;  %v58_v4 = vld [vmem:[#allocation7 + $0x18] sm:$0xff]  ;;  %v201_v5 = vsel %vm45_vm0, %v57_v2, 0.0  ;;  %v56_v8 = vld [vmem:[#allocation7 + $0x8] sm:$0xff]  ;;  %vm168_vm1 = vcmask 1041409  }
  0x28   :  { %76 = vperm.xlu1 %299, %v57_v2   ;;  %66 = vperm.xlu0 %298, %v55_v3   ;;  %v187_v6 = vsel %vm45_vm0, %v55_v3, 0.0  ;;  %v208_v7 = vsel %vm45_vm0, %v58_v4, 0.0  ;;  %v60_v9 = vld [vmem:[#allocation7 + $0x28] sm:$0xff]  ;;  %v59_v10 = vld [vmem:[#allocation7 + $0x20] sm:$0xff]  ;;  %v202_v11 = vrot.slane %v201_v5, 4  ;;  %v194_v14 = vsel %vm45_vm0, %v56_v8, 0.0 }
  0x29   :  { %v188_v12 = vrot.slane %v187_v6, 4  ;;  %v209_v13 = vrot.slane %v208_v7, 4  ;;  %v62_v15 = vld [vmem:[#allocation7 + $0x38] sm:$0xff]  ;;  %v61_v16 = vld [vmem:[#allocation7 + $0x30] sm:$0xff]  ;;  %v195_v17 = vrot.slane %v194_v14, 4  ;;  %v222_v18 = vsel %vm45_vm0, %v60_v9, 0.0 }
  0x2a   :  { %v215_v19 = vsel %vm45_vm0, %v59_v10, 0.0  ;;  %v236_v20 = vsel %vm45_vm0, %v62_v15, 0.0  ;;  %v203_v21 = vadd.f32 %v202_v11, %v201_v5  ;;  %v223_v24 = vrot.slane %v222_v18, 4  ;;  %s380_s1 = smov [#allocation9]  }
  0x2b   :  { %v189_v22 = vadd.f32 %v188_v12, %v187_v6  ;;  %v210_v23 = vadd.f32 %v209_v13, %v208_v7  ;;  %vm170_vm2 = vcmask 1042434   ;;  %v196_v25 = vadd.f32 %v195_v17, %v194_v14  ;;  %v49_v13 = vld [vmem:[#allocation4 + $0x10] sm:$0xff]  ;;  %v47_v14 = vld [vmem:[#allocation4] sm:$0xff]  ;;  %s281_s6 = sshll.u32 %s380_s1, 4  ;;  %s282_s6 = int_to_ptr.vmem [resolvable:$true] %s281_s6 }
  0x2c   :  { %81 = vperm.xlu1 %299, %v58_v4   ;;  %71 = vperm.xlu0 %298, %v56_v8   ;;  %v216_v26 = vrot.slane %v215_v19, 4  ;;  %v237_v27 = vrot.slane %v236_v20, 4  ;;  %v229_v28 = vsel %vm45_vm0, %v61_v16, 0.0  ;;  %v204_v29 = vrot.slane %v203_v21, 2  ;;  %s346_s7 = scalar_lea.vmem %s282_s6, 128  ;;  %p351_p3 = scmp.lt.s32.totalorder %s282_s6, %s282_s6 }
  0x2d   :  { %v190_v30 = vrot.slane %v189_v22, 2  ;;  %v211_v31 = vrot.slane %v210_v23, 2  ;;  %v224_v32 = vadd.f32 %v223_v24, %v222_v18  ;;  %v197_v33 = vrot.slane %v196_v25, 2  ;;  %p347_p2 = scmp.ne.s32.totalorder %s282_s6, %s346_s7  ;;  %p352_p4 = scmp.lt.s32.totalorder %s346_s7, %s346_s7 }
  0x2e   :  { %v217_v34 = vadd.f32 %v216_v26, %v215_v19  ;;  %v238_v35 = vadd.f32 %v237_v27, %v236_v20  ;;  %v230_v36 = vrot.slane %v229_v28, 4  ;;  %v205_v37 = vadd.f32 %v204_v29, %v203_v21  ;;  %v185_v6 = vld [vmem:[#allocation3] sm:$0xff]  ;;  %v48_v20 = vld [vmem:[#allocation4 + $0x8] sm:$0xff] }
  0x2f   :  { %v191_v38 = vadd.f32 %v190_v30, %v189_v22  ;;  %v212_v39 = vadd.f32 %v211_v31, %v210_v23  ;;  %v225_v40 = vrot.slane %v224_v32, 2  ;;  %v198_v41 = vadd.f32 %v197_v33, %v196_v25  ;;  %v50_v19 = vld [vmem:[#allocation4 + $0x18] sm:$0xff]  ;;  %v52_v29 = vld [vmem:[#allocation4 + $0x28] sm:$0xff]  ;;  %v51_v30 = vld [vmem:[#allocation4 + $0x20] sm:$0xff]  ;;  %p353_p5 = por %p352_p4, %p351_p3 }
  0x30   :  { %91 = vperm.xlu1 %299, %v60_v9   ;;  %v218_v42 = vrot.slane %v217_v34, 2  ;;  %86 = vperm.xlu0 %298, %v59_v10   ;;  %v239_v43 = vrot.slane %v238_v35, 2  ;;  %v231_v44 = vadd.f32 %v230_v36, %v229_v28  ;;  %v206_v45 = vrot.slane %v205_v37, 1 }
  0x31   :  { %v192_v46 = vrot.slane %v191_v38, 1  ;;  %v213_v47 = vrot.slane %v212_v39, 1  ;;  %v226_v48 = vadd.f32 %v225_v40, %v224_v32  ;;  %v199_v49 = vrot.slane %v198_v41, 1  ;;  %v53_v40 = vld [vmem:[#allocation4 + $0x30] sm:$0xff]  ;;  %p354_p6 = pnand %p353_p5, %p347_p2 }
  0x32   :  { %v219_v50 = vadd.f32 %v218_v42, %v217_v34  ;;  %v240_v51 = vadd.f32 %v239_v43, %v238_v35  ;;  %v232_v52 = vrot.slane %v231_v44, 2  ;;  %v207_v53 = vadd.f32 %v206_v45, %v205_v37 }
  0x33   :  { %v193_v54 = vadd.f32 %v192_v46, %v191_v38  ;;  %v214_v55 = vadd.f32 %v213_v47, %v212_v39  ;;  %v227_v56 = vrot.slane %v226_v48, 1  ;;  %v200_v57 = vadd.f32 %v199_v49, %v198_v41  ;;  %v54_v46 = vld [vmem:[#allocation4 + $0x38] sm:$0xff] }
  0x34   :  { %v220_v58 = vrot.slane %v219_v50, 1  ;;  %v241_v59 = vrot.slane %v240_v51, 1  ;;  %101 = vperm.xlu1 %299, %v62_v15   ;;  %v233_v60 = vadd.f32 %v232_v52, %v231_v44  ;;  %96 = vperm.xlu0 %298, %v61_v16   ;;  %vm172_vm3 = vcmask 1043459  }
  0x35   :  { %vm174_vm4 = vcmask 1044484   ;;  %v251_v61 = vsel %vm168_vm1, %v200_v57, %v193_v54  ;;  %v228_v62 = vadd.f32 %v227_v56, %v226_v48  ;;  %vm176_vm5 = vcmask 1045509  }
  0x36   :  { %v221_v63 = vadd.f32 %v220_v58, %v219_v50  ;;  %v234_v0 = vrot.slane %v233_v60, 1  ;;  %v252_v1 = vsel %vm170_vm2, %v207_v53, %v251_v61  ;;  %v242_v3 = vadd.f32 %v241_v59, %v240_v51 }
  0x37   :  { %v253_v2 = vsel %vm172_vm3, %v214_v55, %v252_v1  ;;  %vm178_vm6 = vcmask 1046534   ;;  %vm180_vm7 = vcmask 1047559  }
  0x38   :  { %v235_v4 = vadd.f32 %v234_v0, %v233_v60  ;;  %v254_v5 = vsel %vm174_vm4, %v221_v63, %v253_v2 }
  0x39   :  { %v255_v7 = vsel %vm176_vm5, %v228_v62, %v254_v5 }
  0x3a   :  { %v256_v8 = vsel %vm178_vm6, %v235_v4, %v255_v7 }
  0x3b   :  { %v257_v9 = vsel %vm180_vm7, %v242_v3, %v256_v8 }
  0x3c   :  { %v259_v10 = vadd.f32 %v257_v9, %v185_v6 }
  0x3e   :  { %260 = vst.msk [vmem:[#allocation3] sm:$0xff] %vm45_vm0, %v259_v10 }
  0x45   :  { %v264_v11 = vld [vmem:[#allocation3] sm:$0xff] }
  0x46   :  { %v265_v12 = vmax.f32 %v264_v11, 1e-09 }
  0x48   :  { %269 = vperm.xlu0 %298, %v265_v12  }
  0xa7   :  { %v77_v15 = vpop.permute.xlu1 %76  ;;  %v67_v16 = vpop.permute.xlu0 %66 }
  0xa8   :  { %v106_v17 = vmul.f32 %v77_v15, %v49_v13  ;;  %v104_v18 = vmul.f32 %v67_v16, %v47_v14 }
  0xaa   :  { %v112_v21 = vrot.slane %v104_v18, 4  ;;  %v124_v24 = vrot.slane %v106_v17, 4 }
  0xab   :  { %v82_v22 = vpop.permute.xlu1 %81  ;;  %v72_v23 = vpop.permute.xlu0 %71 }
  0xac   :  { %v107_v25 = vmul.f32 %v82_v22, %v50_v19  ;;  %v105_v26 = vmul.f32 %v72_v23, %v48_v20  ;;  %v113_v27 = vadd.f32 %v112_v21, %v104_v18  ;;  %v125_v34 = vadd.f32 %v124_v24, %v106_v17 }
  0xae   :  { %v118_v28 = vrot.slane %v105_v26, 4  ;;  %v130_v31 = vrot.slane %v107_v25, 4  ;;  %v114_v36 = vrot.slane %v113_v27, 2  ;;  %v126_v44 = vrot.slane %v125_v34, 2 }
  0xaf   :  { %v92_v32 = vpop.permute.xlu1 %91  ;;  %v87_v33 = vpop.permute.xlu0 %86 }
  0xb0   :  { %v119_v35 = vadd.f32 %v118_v28, %v105_v26  ;;  %v109_v37 = vmul.f32 %v92_v32, %v52_v29  ;;  %v108_v38 = vmul.f32 %v87_v33, %v51_v30  ;;  %v131_v41 = vadd.f32 %v130_v31, %v107_v25 }
  0xb1   :  { %v115_v47 = vadd.f32 %v114_v36, %v113_v27  ;;  %v127_v54 = vadd.f32 %v126_v44, %v125_v34 }
  0xb2   :  { %v120_v39 = vrot.slane %v119_v35, 2  ;;  %v136_v42 = vrot.slane %v108_v38, 4  ;;  %v142_v49 = vrot.slane %v109_v37, 4  ;;  %v132_v52 = vrot.slane %v131_v41, 2 }
  0xb3   :  { %v97_v43 = vpop.permute.xlu0 %96  ;;  %v102_v45 = vpop.permute.xlu1 %101  ;;  %v116_v56 = vrot.slane %v115_v47, 1  ;;  %v128_v62 = vrot.slane %v127_v54, 1 }
  0xb4   :  { %v121_v48 = vadd.f32 %v120_v39, %v119_v35  ;;  %v110_v50 = vmul.f32 %v97_v43, %v53_v40  ;;  %v137_v51 = vadd.f32 %v136_v42, %v108_v38  ;;  %v111_v53 = vmul.f32 %v102_v45, %v54_v46 }
  0xb5   :  { %v143_v58 = vadd.f32 %v142_v49, %v109_v37  ;;  %v133_v60 = vadd.f32 %v132_v52, %v131_v41  ;;  %v117_v0 = vadd.f32 %v116_v56, %v115_v47  ;;  %v129_v6 = vadd.f32 %v128_v62, %v127_v54 }
  0xb6   :  { %v148_v55 = vrot.slane %v110_v50, 4  ;;  %v122_v57 = vrot.slane %v121_v48, 1  ;;  %v138_v59 = vrot.slane %v137_v51, 2  ;;  %v154_v61 = vrot.slane %v111_v53, 4 }
  0xb7   :  { %v144_v2 = vrot.slane %v143_v58, 2  ;;  %v134_v4 = vrot.slane %v133_v60, 1 }
  0xb8   :  { %v149_v63 = vadd.f32 %v148_v55, %v110_v50  ;;  %v123_v1 = vadd.f32 %v122_v57, %v121_v48  ;;  %v139_v3 = vadd.f32 %v138_v59, %v137_v51  ;;  %v155_v5 = vadd.f32 %v154_v61, %v111_v53 }
  0xb9   :  { %v145_v9 = vadd.f32 %v144_v2, %v143_v58  ;;  %v135_v11 = vadd.f32 %v134_v4, %v133_v60 }
  0xba   :  { %v150_v7 = vrot.slane %v149_v63, 2  ;;  %v169_v8 = vsel %vm168_vm1, %v123_v1, %v117_v0  ;;  %v140_v10 = vrot.slane %v139_v3, 1  ;;  %v156_v12 = vrot.slane %v155_v5, 2 }
  0xbb   :  { %v171_v13 = vsel %vm170_vm2, %v129_v6, %v169_v8  ;;  %v146_v15 = vrot.slane %v145_v9, 1 }
  0xbc   :  { %v151_v14 = vadd.f32 %v150_v7, %v149_v63  ;;  %v141_v16 = vadd.f32 %v140_v10, %v139_v3  ;;  %v173_v17 = vsel %vm172_vm3, %v135_v11, %v171_v13  ;;  %v157_v18 = vadd.f32 %v156_v12, %v155_v5 }
  0xbd   :  { %v147_v21 = vadd.f32 %v146_v15, %v145_v9 }
  0xbe   :  { %v152_v19 = vrot.slane %v151_v14, 1  ;;  %v175_v22 = vsel %vm174_vm4, %v141_v16, %v173_v17  ;;  %v158_v23 = vrot.slane %v157_v18, 1 }
  0xbf   :  { %v177_v25 = vsel %vm176_vm5, %v147_v21, %v175_v22 }
  0xc0   :  { %v153_v24 = vadd.f32 %v152_v19, %v151_v14  ;;  %v159_v26 = vadd.f32 %v158_v23, %v157_v18 }
  0xc2   :  { %v179_v27 = vsel %vm178_vm6, %v153_v24, %v177_v25 }
  0xc3   :  { %v181_v29 = vsel %vm180_vm7, %v159_v26, %v179_v27 }
  0xc7   :  { %v270_v20 = vpop.permute.xlu0 %269 }
  0xc8   :  { %300 = vrcp.f32 %v270_v20 }
  0xd2   :  { %v301_v28 = vpop.eup %300 }
  0xd3   :  { %v273_v30 = vmul.f32 %v301_v28, %v181_v29 }
  0xd5   :  { %274 = vst [vmem:[#allocation9] sm:$0xff] %v273_v30 }
  0xd6   :  { %357 = shalt.err (!%p354_p6)
}
  0xd7   :  { %s358_s10 = scalar_lea.hbm %s458_s2, 128 }
  0xd8   :  { %p359_p7 = scmp.ne.s32.totalorder %s458_s2, %s358_s10  ;;  %p362_p8 = scmp.lt.u32.totalorder %s358_s10, %s458_s2 }
  0xda   :  { %p364_p9 = pnand %p362_p8, %p359_p7 }
  0xdc   :  { %367 = shalt.err (!%p364_p9)
}
  0xdd   :  { %284 = dma.vmem_to_hbm [thread:$0]  %s282_s6, 128, %s458_s2, [#allocation6]  }
  0xde   :  { %372 = dma.done.wait [#allocation6], 128  }
  0xdf   :  { %373 = vsyncadd [#allocation6], 4294967168 }
  0xe0   :  { %288 = vsyncpa [#allocation5], 1 }
  0xe1   :  { %289 = vsyncpa [#allocation8], 1 }
  0xe2   :  { %290 = vsyncpa [#allocation6], 1 }

</bundles_post_ra>
